<compile_context>
chip_gen: v6e
topology: v6e:2x2x1
jax: 0.10.0
libtpu: 0.0.40
codegen_flags: <defaults>
</compile_context>

<pallas_src>
import math
import jax
import jax.numpy as jnp
from jax.experimental import pallas as pl
from jax.experimental.pallas import tpu as pltpu

RRELU_EVAL_SLOPE = (1.0 / 8.0 + 1.0 / 3.0) / 2.0   # nn.RReLU() default lower/upper
BN_EPS = 1e-5

LANE = 128
SUBLANE = 8


def _round_up(x, m):
    return ((x + m - 1) // m) * m


# ----------------------------- Pallas kernel ------------------------------- #

def _make_fused_kernel(out_pads, use_bf16):
    """Kernel body that chains every layer of the MLP in one pallas_call.

    Ref layout: (x_ref, w_0, ..., w_{L-1}, b_all_ref, o_ref).
    `out_pads[li]` is the (128-padded) output width of layer li.
    """
    n_layers = len(out_pads)

    def kernel(x_ref, *refs):
        w_refs = refs[:n_layers]
        b_ref = refs[n_layers]          # (n_layers, W_max) stacked folded biases
        o_ref = refs[n_layers + 1]

        h = x_ref[...]                  # (TB, D0_pad) f32
        for li in range(n_layers):
            n_out = out_pads[li]
            w = w_refs[li][...]
            lhs, rhs = h, w
            if use_bf16:
                lhs = lhs.astype(jnp.bfloat16)
                rhs = rhs.astype(jnp.bfloat16)
            y = jnp.dot(lhs, rhs, preferred_element_type=jnp.float32)
            y = y + b_ref[li:li + 1, :n_out]          # folded bias (+BN shift)
            if li < n_layers - 1:
                y = jnp.where(y >= 0, y, y * RRELU_EVAL_SLOPE)  # RReLU eval slope
            h = y
        o_ref[...] = h.astype(o_ref.dtype)

    return kernel


# ------------------------------ parameters --------------------------------- #

def init_fcnet_params(nodes, key):
    """Deterministic init mimicking PyTorch defaults (unfolded, unpadded).

    Linear: weight, bias ~ U(-1/sqrt(fan_in), 1/sqrt(fan_in)); weight stored as
    (in, out) == torch_weight.T.  BatchNorm1d: gamma=1, beta=0, rm=0, rv=1.
    """
    params = []
    n_layers = len(nodes) - 1
    for li in range(n_layers):
        n_in, n_out = nodes[li], nodes[li + 1]
        key, kw, kb = jax.random.split(key, 3)
        bound = 1.0 / math.sqrt(n_in)
        w = jax.random.uniform(kw, (n_in, n_out), jnp.float32, -bound, bound)
        b = jax.random.uniform(kb, (n_out,), jnp.float32, -bound, bound)
        layer = {"w": w, "b": b}
        if li < n_layers - 1:  # hidden layers carry BatchNorm1d
            layer["gamma"] = jnp.ones((n_out,), jnp.float32)
            layer["beta"] = jnp.zeros((n_out,), jnp.float32)
            layer["running_mean"] = jnp.zeros((n_out,), jnp.float32)
            layer["running_var"] = jnp.ones((n_out,), jnp.float32)
        params.append(layer)
    return params


def prepare_fused_params(params, use_bf16=False):
    """Fold eval-mode BatchNorm into Linear weights/bias and pad every feature
    dim up to a multiple of 128 lanes with zeros (padded features remain 0)."""
    n_layers = len(params)
    w_pads, b_vecs, out_pads = [], [], []
    for li, layer in enumerate(params):
        w, b = layer["w"], layer["b"]
        if li < n_layers - 1:
            scale = layer["gamma"] / jnp.sqrt(layer["running_var"] + BN_EPS)
            shift = layer["beta"] - layer["running_mean"] * scale
            w = w * scale[None, :]
            b = b * scale + shift
        n_in, n_out = w.shape
        in_pad, out_pad = _round_up(n_in, LANE), _round_up(n_out, LANE)
        w_p = jnp.zeros((in_pad, out_pad), jnp.float32).at[:n_in, :n_out].set(w)
        if use_bf16:
            w_p = w_p.astype(jnp.bfloat16)
        b_p = jnp.zeros((out_pad,), jnp.float32).at[:n_out].set(b)
        w_pads.append(w_p)
        b_vecs.append(b_p)
        out_pads.append(out_pad)
    w_max = max(b.shape[0] for b in b_vecs)
    b_all = jnp.stack(
        [jnp.zeros((w_max,), jnp.float32).at[:b.shape[0]].set(b) for b in b_vecs],
        axis=0)  # (n_layers, w_max)
    return {
        "weights": w_pads,
        "biases": b_all,
        "out_pads": tuple(out_pads),
        "in_dim": params[0]["w"].shape[0],
        "in_pad": w_pads[0].shape[0],
        "out_dim": params[-1]["w"].shape[1],
        "use_bf16": use_bf16,
    }


# -------------------------------- forward ----------------------------------- #

def fcnet_forward(fused, x, *, batch_tile=256):
    weights = fused["weights"]
    b_all = fused["biases"]
    out_pads = fused["out_pads"]
    in_pad = fused["in_pad"]
    B, D = x.shape
    assert D == fused["in_dim"], (D, fused["in_dim"])

    # Batch tile: multiple of 8 sublanes, clipped to the (padded) batch.
    TB = _round_up(min(batch_tile, _round_up(B, SUBLANE)), SUBLANE)
    B_pad = _round_up(B, TB)
    x_pad = jnp.zeros((B_pad, in_pad), jnp.float32).at[:B, :D].set(x)

    out_pad = out_pads[-1]
    grid = (B_pad // TB,)

    kernel = _make_fused_kernel(out_pads, fused["use_bf16"])

    in_specs = [pl.BlockSpec((TB, in_pad), lambda i: (i, 0))]        # activations: batch-tiled
    for w in weights:                                                # weights: VMEM-resident
        in_specs.append(pl.BlockSpec(w.shape, lambda i: (0, 0)))
    in_specs.append(pl.BlockSpec(b_all.shape, lambda i: (0, 0)))     # stacked folded biases

    out = pl.pallas_call(
        kernel,
        out_shape=jax.ShapeDtypeStruct((B_pad, out_pad), jnp.float32),
        grid=grid,
        in_specs=in_specs,
        out_specs=pl.BlockSpec((TB, out_pad), lambda i: (i, 0)),
        compiler_params=pltpu.CompilerParams(
            dimension_semantics=("parallel",),      # shards batch tiles across v7x's 2 TCs
            vmem_limit_bytes=32 * 1024 * 1024,      # safe on v5e/v6e/v7x
        ),
    )(x_pad, *weights, b_all)

    return out[:B, :fused["out_dim"]]


def fcnet_reference(params, x):
    """Pure-JAX reference with the original (unfolded) Linear + BN + RReLU math."""
    n_layers = len(params)
    h = x
    for li, layer in enumerate(params):
        y = h @ layer["w"] + layer["b"]
        if li < n_layers - 1:
            scale = layer["gamma"] / jnp.sqrt(layer["running_var"] + BN_EPS)
            shift = layer["beta"] - layer["running_mean"] * scale
            y = y * scale + shift
            y = jnp.where(y >= 0, y, y * RRELU_EVAL_SLOPE)
        h = y
    return h


# ----------------------------------- main ----------------------------------- #

if __name__ == "__main__":
    # Small, decreasing node list (node_in=32, hidden_layer=3, node_out=6).
    nodes = [32, 24, 16, 8, 6]
    batch = 8

    key = jax.random.PRNGKey(0)
    key, kx = jax.random.split(key)
    x = jax.random.normal(kx, (batch, nodes[0]), jnp.float32)

    params = init_fcnet_params(nodes, key)
    # use_bf16=True is the recommended setting for realistic ecopann widths
    # (thousands); keep f32 here so the 1e-5 comparison against the f32 reference holds.
    fused = prepare_fused_params(params, use_bf16=False)

    out = fcnet_forward(fused, x)
    out = jax.block_until_ready(out)

    ref = fcnet_reference(params, x)
    assert out.shape == (batch, nodes[-1]), out.shape
    assert jnp.allclose(out, ref, atol=1e-5, rtol=1e-5), "mismatch vs reference"

    print("KERNEL_OK")
</pallas_src>

<mosaic_0001>
module attributes {stable_mosaic.version = 11 : i64} {
  func.func @kernel(%arg0: i32, %arg1: memref<8x128xf32, #tpu.memory_space<vmem>>, %arg2: memref<128x128xf32, #tpu.memory_space<vmem>>, %arg3: memref<128x128xf32, #tpu.memory_space<vmem>>, %arg4: memref<128x128xf32, #tpu.memory_space<vmem>>, %arg5: memref<128x128xf32, #tpu.memory_space<vmem>>, %arg6: memref<4x128xf32, #tpu.memory_space<vmem>>, %arg7: memref<8x128xf32, #tpu.memory_space<vmem>>) attributes {dimension_semantics = [#tpu.dimension_semantics<parallel>], iteration_bounds = array<i64: 1>, scalar_prefetch = 0 : i64, scratch_operands = 0 : i64, tpu.core_type = #tpu.core_type<tc>, window_params = [{transform_indices = @transform_0, window_bounds = array<i64: 8, 128>}, {pipeline_mode = #tpu.pipeline_mode<synchronous>, transform_indices = @transform_1, window_bounds = array<i64: 128, 128>}, {pipeline_mode = #tpu.pipeline_mode<synchronous>, transform_indices = @transform_2, window_bounds = array<i64: 128, 128>}, {pipeline_mode = #tpu.pipeline_mode<synchronous>, transform_indices = @transform_3, window_bounds = array<i64: 128, 128>}, {pipeline_mode = #tpu.pipeline_mode<synchronous>, transform_indices = @transform_4, window_bounds = array<i64: 128, 128>}, {pipeline_mode = #tpu.pipeline_mode<synchronous>, transform_indices = @transform_5, window_bounds = array<i64: 4, 128>}, {transform_indices = @transform_6, window_bounds = array<i64: 8, 128>}]} {
    %c0 = arith.constant 0 : index
    %c0_0 = arith.constant 0 : index
    %0 = vector.load %arg1[%c0, %c0_0] : memref<8x128xf32, #tpu.memory_space<vmem>>, vector<8x128xf32>
    %c0_1 = arith.constant 0 : index
    %c0_2 = arith.constant 0 : index
    %1 = vector.load %arg2[%c0_1, %c0_2] : memref<128x128xf32, #tpu.memory_space<vmem>>, vector<128x128xf32>
    %cst = arith.constant dense<0.000000e+00> : vector<8x128xf32>
    %2 = tpu.matmul %0, %1, %cst {dimension_numbers = #tpu.dot_dimension_numbers<[1], [0], [0], [1], [0, 0, 1, 1], [], []>} : vector<8x128xf32>, vector<128x128xf32>, vector<8x128xf32> -> vector<8x128xf32>
    %c0_3 = arith.constant 0 : index
    %c0_4 = arith.constant 0 : index
    %3 = vector.load %arg6[%c0_3, %c0_4] : memref<4x128xf32, #tpu.memory_space<vmem>>, vector<1x128xf32>
    %4 = vector.broadcast %3 : vector<1x128xf32> to vector<8x128xf32>
    %5 = arith.addf %2, %4 : vector<8x128xf32>
    %cst_5 = arith.constant 0.000000e+00 : f32
    %6 = vector.broadcast %cst_5 : f32 to vector<8x128xf32>
    %7 = arith.cmpf oge, %5, %6 : vector<8x128xf32>
    %cst_6 = arith.constant 0.229166672 : f32
    %8 = vector.broadcast %cst_6 : f32 to vector<8x128xf32>
    %9 = arith.mulf %5, %8 : vector<8x128xf32>
    %10 = arith.select %7, %5, %9 : vector<8x128xi1>, vector<8x128xf32>
    %c0_7 = arith.constant 0 : index
    %c0_8 = arith.constant 0 : index
    %11 = vector.load %arg3[%c0_7, %c0_8] : memref<128x128xf32, #tpu.memory_space<vmem>>, vector<128x128xf32>
    %cst_9 = arith.constant dense<0.000000e+00> : vector<8x128xf32>
    %12 = tpu.matmul %10, %11, %cst_9 {dimension_numbers = #tpu.dot_dimension_numbers<[1], [0], [0], [1], [0, 0, 1, 1], [], []>} : vector<8x128xf32>, vector<128x128xf32>, vector<8x128xf32> -> vector<8x128xf32>
    %c1 = arith.constant 1 : index
    %c0_10 = arith.constant 0 : index
    %13 = vector.load %arg6[%c1, %c0_10] : memref<4x128xf32, #tpu.memory_space<vmem>>, vector<1x128xf32>
    %14 = vector.broadcast %13 : vector<1x128xf32> to vector<8x128xf32>
    %15 = arith.addf %12, %14 : vector<8x128xf32>
    %cst_11 = arith.constant 0.000000e+00 : f32
    %16 = vector.broadcast %cst_11 : f32 to vector<8x128xf32>
    %17 = arith.cmpf oge, %15, %16 : vector<8x128xf32>
    %cst_12 = arith.constant 0.229166672 : f32
    %18 = vector.broadcast %cst_12 : f32 to vector<8x128xf32>
    %19 = arith.mulf %15, %18 : vector<8x128xf32>
    %20 = arith.select %17, %15, %19 : vector<8x128xi1>, vector<8x128xf32>
    %c0_13 = arith.constant 0 : index
    %c0_14 = arith.constant 0 : index
    %21 = vector.load %arg4[%c0_13, %c0_14] : memref<128x128xf32, #tpu.memory_space<vmem>>, vector<128x128xf32>
    %cst_15 = arith.constant dense<0.000000e+00> : vector<8x128xf32>
    %22 = tpu.matmul %20, %21, %cst_15 {dimension_numbers = #tpu.dot_dimension_numbers<[1], [0], [0], [1], [0, 0, 1, 1], [], []>} : vector<8x128xf32>, vector<128x128xf32>, vector<8x128xf32> -> vector<8x128xf32>
    %c2 = arith.constant 2 : index
    %c0_16 = arith.constant 0 : index
    %23 = vector.load %arg6[%c2, %c0_16] : memref<4x128xf32, #tpu.memory_space<vmem>>, vector<1x128xf32>
    %24 = vector.broadcast %23 : vector<1x128xf32> to vector<8x128xf32>
    %25 = arith.addf %22, %24 : vector<8x128xf32>
    %cst_17 = arith.constant 0.000000e+00 : f32
    %26 = vector.broadcast %cst_17 : f32 to vector<8x128xf32>
    %27 = arith.cmpf oge, %25, %26 : vector<8x128xf32>
    %cst_18 = arith.constant 0.229166672 : f32
    %28 = vector.broadcast %cst_18 : f32 to vector<8x128xf32>
    %29 = arith.mulf %25, %28 : vector<8x128xf32>
    %30 = arith.select %27, %25, %29 : vector<8x128xi1>, vector<8x128xf32>
    %c0_19 = arith.constant 0 : index
    %c0_20 = arith.constant 0 : index
    %31 = vector.load %arg5[%c0_19, %c0_20] : memref<128x128xf32, #tpu.memory_space<vmem>>, vector<128x128xf32>
    %cst_21 = arith.constant dense<0.000000e+00> : vector<8x128xf32>
    %32 = tpu.matmul %30, %31, %cst_21 {dimension_numbers = #tpu.dot_dimension_numbers<[1], [0], [0], [1], [0, 0, 1, 1], [], []>} : vector<8x128xf32>, vector<128x128xf32>, vector<8x128xf32> -> vector<8x128xf32>
    %c3 = arith.constant 3 : index
    %c0_22 = arith.constant 0 : index
    %33 = vector.load %arg6[%c3, %c0_22] : memref<4x128xf32, #tpu.memory_space<vmem>>, vector<1x128xf32>
    %34 = vector.broadcast %33 : vector<1x128xf32> to vector<8x128xf32>
    %35 = arith.addf %32, %34 : vector<8x128xf32>
    %c0_23 = arith.constant 0 : index
    %c0_24 = arith.constant 0 : index
    %36 = vector.load %arg7[%c0_23, %c0_24] : memref<8x128xf32, #tpu.memory_space<vmem>>, vector<8x128xf32>
    tpu.vector_store %arg7[%c0_23, %c0_24], %35 {strides = array<i32>} : memref<8x128xf32, #tpu.memory_space<vmem>>, vector<8x128xf32>,
    return
  }
  func.func @transform_0(%arg0: i32) -> (i32, i32) {
    %c0_i32 = arith.constant 0 : i32
    %c0_i32_0 = arith.constant 0 : i32
    return %arg0, %c0_i32 : i32, i32
  }
  func.func @transform_1(%arg0: i32) -> (i32, i32) {
    %c0_i32 = arith.constant 0 : i32
    %c0_i32_0 = arith.constant 0 : i32
    %c0_i32_1 = arith.constant 0 : i32
    return %c0_i32, %c0_i32_0 : i32, i32
  }
  func.func @transform_2(%arg0: i32) -> (i32, i32) {
    %c0_i32 = arith.constant 0 : i32
    %c0_i32_0 = arith.constant 0 : i32
    %c0_i32_1 = arith.constant 0 : i32
    return %c0_i32, %c0_i32_0 : i32, i32
  }
  func.func @transform_3(%arg0: i32) -> (i32, i32) {
    %c0_i32 = arith.constant 0 : i32
    %c0_i32_0 = arith.constant 0 : i32
    %c0_i32_1 = arith.constant 0 : i32
    return %c0_i32, %c0_i32_0 : i32, i32
  }
  func.func @transform_4(%arg0: i32) -> (i32, i32) {
    %c0_i32 = arith.constant 0 : i32
    %c0_i32_0 = arith.constant 0 : i32
    %c0_i32_1 = arith.constant 0 : i32
    return %c0_i32, %c0_i32_0 : i32, i32
  }
  func.func @transform_5(%arg0: i32) -> (i32, i32) {
    %c0_i32 = arith.constant 0 : i32
    %c0_i32_0 = arith.constant 0 : i32
    %c0_i32_1 = arith.constant 0 : i32
    return %c0_i32, %c0_i32_0 : i32, i32
  }
  func.func @transform_6(%arg0: i32) -> (i32, i32) {
    %c0_i32 = arith.constant 0 : i32
    %c0_i32_0 = arith.constant 0 : i32
    return %arg0, %c0_i32 : i32, i32
  }
}

</mosaic_0001>

<bundles_post_ra>
// kernel: tpu_custom_call.1
= control target key start
LH: loop header
LB: loop body
LE: loop exit
PB: predicated region body
PF: predicated region fallthrough
CT: control target
= control target key end

     0   :  { %11 = vsyncpa [#allocation3], 0  ;;  %s991_s0 = inlined_call_operand.hbm [shape: f32[8,128], index: 0, kind: input, shape index: {}]   ;;  %s992_s1 = inlined_call_operand.hbm [shape: f32[128,128], index: 1, kind: input, shape index: {}]   ;;  %s993_s2 = inlined_call_operand.hbm [shape: f32[128,128], index: 2, kind: input, shape index: {}]   ;;  %s994_s3 = inlined_call_operand.hbm [shape: f32[128,128], index: 3, kind: input, shape index: {}]   ;;  %s995_s4 = inlined_call_operand.hbm [shape: f32[128,128], index: 4, kind: input, shape index: {}]   ;;  %s996_s5 = inlined_call_operand.vmem [shape: f32[4,128], index: 5, kind: input, shape index: {}]   ;;  %s997_s6 = inlined_call_operand.hbm [shape: f32[8,128], index: 6, kind: output, shape index: {}]  }
   0x1   :  { %12 = vsyncpa [#allocation6], 0 }
   0x2   :  { %13 = vsyncpa [#allocation9], 0 }
   0x3   :  { %14 = vsyncpa [#allocation4], 0  ;;  %s832_s21 = smov [#allocation5]  }
   0x4   :  { %s30_s22 = sshll.u32 %s832_s21, 4  ;;  %s31_s22 = int_to_ptr.vmem [resolvable:$true] %s30_s22 }
   0x5   :  { %s712_s23 = scalar_lea.vmem %s31_s22, 2048  ;;  %p717_p1 = scmp.lt.s32.totalorder %s31_s22, %s31_s22 }
   0x6   :  { %p713_p0 = scmp.ne.s32.totalorder %s31_s22, %s712_s23  ;;  %p718_p2 = scmp.lt.s32.totalorder %s712_s23, %s712_s23 }
   0x8   :  { %p719_p3 = por %p718_p2, %p717_p1 }
   0xa   :  { %p720_p4 = pnand %p719_p3, %p713_p0 }
   0xc   :  { %723 = shalt.err (!%p720_p4)
}
   0xd   :  { %s833_s24 = smov 128   ;;  %s834_s25 = smov 8  }
   0xe   :  { %36 = dma.hbm_to_vmem [thread:$0]  %s992_s1, 2048, %s31_s22, [#allocation6], %s833_s24, %s833_s24, %s834_s25  }
   0xf   :  { %s835_s28 = smov [#allocation8]   ;;  %s836_s30 = smov [#allocation2]  }
  0x10   :  { %s54_s29 = sshll.u32 %s835_s28, 4  ;;  %s21_s7 = sshll.u32 %s836_s30, 4  ;;  %s55_s29 = int_to_ptr.vmem [resolvable:$true] %s54_s29  ;;  %s22_s7 = int_to_ptr.vmem [resolvable:$true] %s21_s7 }
  0x11   :  { %s732_s8 = scalar_lea.vmem %s55_s29, 2048  ;;  %p737_p6 = scmp.lt.s32.totalorder %s55_s29, %s55_s29 }
  0x12   :  { %p733_p5 = scmp.ne.s32.totalorder %s55_s29, %s732_s8  ;;  %p738_p7 = scmp.lt.s32.totalorder %s732_s8, %s732_s8 }
  0x14   :  { %p739_p8 = por %p738_p7, %p737_p6 }
  0x16   :  { %p740_p9 = pnand %p739_p8, %p733_p5 }
  0x18   :  { %743 = shalt.err (!%p740_p9)
}
  0x19   :  { %60 = dma.hbm_to_vmem [thread:$0]  %s994_s3, 2048, %s55_s29, [#allocation9], %s833_s24, %s833_s24, %s834_s25  }
  0x1a   :  { %s752_s1 = scalar_lea.vmem %s22_s7, 128  ;;  %p757_p11 = scmp.lt.s32.totalorder %s22_s7, %s22_s7 }
  0x1b   :  { %p753_p10 = scmp.ne.s32.totalorder %s22_s7, %s752_s1  ;;  %p758_p12 = scmp.lt.s32.totalorder %s752_s1, %s752_s1 }
  0x1d   :  { %p759_p13 = por %p758_p12, %p757_p11 }
  0x1f   :  { %p760_p0 = pnand %p759_p13, %p753_p10 }
  0x21   :  { %763 = shalt.err (!%p760_p0)
}
  0x22   :  { %24 = dma.hbm_to_vmem [thread:$0]  %s991_s0, 128, %s22_s7, [#allocation3]  }
  0x23   :  { %s837_s13 = smov [#allocation7]   ;;  %s838_s15 = smov [#allocation10]  }
  0x24   :  { %s42_s14 = sshll.u32 %s837_s13, 4  ;;  %s66_s16 = sshll.u32 %s838_s15, 4  ;;  %s43_s14 = int_to_ptr.vmem [resolvable:$true] %s42_s14  ;;  %s67_s16 = int_to_ptr.vmem [resolvable:$true] %s66_s16 }
  0x25   :  { %s772_s17 = scalar_lea.vmem %s43_s14, 2048  ;;  %p777_p2 = scmp.lt.s32.totalorder %s43_s14, %s43_s14 }
  0x26   :  { %p773_p1 = scmp.ne.s32.totalorder %s43_s14, %s772_s17  ;;  %p778_p3 = scmp.lt.s32.totalorder %s772_s17, %s772_s17 }
  0x28   :  { %p779_p4 = por %p778_p3, %p777_p2 }
  0x2a   :  { %p780_p5 = pnand %p779_p4, %p773_p1 }
  0x2c   :  { %783 = shalt.err (!%p780_p5)
}
  0x2d   :  { %48 = dma.hbm_to_vmem [thread:$0]  %s993_s2, 2048, %s43_s14, [#allocation6], %s833_s24, %s833_s24, %s834_s25  }
  0x2e   :  { %s792_s0 = scalar_lea.vmem %s67_s16, 2048  ;;  %p797_p7 = scmp.lt.s32.totalorder %s67_s16, %s67_s16 }
  0x2f   :  { %p793_p6 = scmp.ne.s32.totalorder %s67_s16, %s792_s0  ;;  %p798_p8 = scmp.lt.s32.totalorder %s792_s0, %s792_s0 }
  0x31   :  { %p799_p9 = por %p798_p8, %p797_p7 }
  0x33   :  { %p800_p10 = pnand %p799_p9, %p793_p6 }
  0x35   :  { %803 = shalt.err (!%p800_p10)
}
  0x36   :  { %72 = dma.hbm_to_vmem [thread:$0]  %s995_s4, 2048, %s67_s16, [#allocation9], %s833_s24, %s833_s24, %s834_s25  }
  0x37   :  { %824 = dma.done.wait [#allocation3], 128  }
  0x38   :  { %825 = vsyncadd [#allocation3], 4294967168 }
  0x39   :  { %826 = dma.done.wait [#allocation6], 4096  }
  0x3a   :  { %827 = vsyncadd [#allocation6], 4294963200 }
  0x3b   :  { %828 = dma.done.wait [#allocation9], 4096  }
  0x3c   :  { %829 = vsyncadd [#allocation9], 4294963200  ;;  %v839_v0 = vmov 0.0   ;;  %vm840_vm0 = vmmov 0   ;;  %v106_v1 = vld [vmem:[#allocation5 + $0x78] sm:$0xff]  ;;  %v105_v2 = vld [vmem:[#allocation5 + $0x70] sm:$0xff] }
  0x3d   :  { %554 = vmatprep.subr.mxu0 %v839_v0  ;;  %586 = vmatprep.mubr.msk.f32.mxu0 %vm840_vm0, %v839_v0  ;;  %v104_v3 = vld [vmem:[#allocation5 + $0x68] sm:$0xff]  ;;  %v103_v4 = vld [vmem:[#allocation5 + $0x60] sm:$0xff]  ;;  %v200_v5 = vld [vmem:[#allocation7 + $0x78] sm:$0xff]  ;;  %s841_s27 = smov [#allocation11]  }
  0x3e   :  { %589 = vmatprep.subr.mxu1 %v839_v0  ;;  %621 = vmatprep.mubr.msk.f32.mxu1 %vm840_vm0, %v839_v0  ;;  %v102_v6 = vld [vmem:[#allocation5 + $0x58] sm:$0xff]  ;;  %v199_v7 = vld [vmem:[#allocation7 + $0x70] sm:$0xff]  ;;  %v198_v8 = vld [vmem:[#allocation7 + $0x68] sm:$0xff]  ;;  %s471_s28 = sshll.u32 %s841_s27, 4  ;;  %s472_s28 = int_to_ptr.vmem [resolvable:$true] %s471_s28 }
  0x3f   :  { %555 = vmatpush3.msra.mxu0 %v106_v1  ;;  %590 = vmatpush3.msra.mxu1 %v200_v5  ;;  %v101_v9 = vld [vmem:[#allocation5 + $0x50] sm:$0xff]  ;;  %v197_v10 = vld [vmem:[#allocation7 + $0x60] sm:$0xff]  ;;  %v100_v11 = vld [vmem:[#allocation5 + $0x48] sm:$0xff]  ;;  %s804_s29 = scalar_lea.vmem %s472_s28, 128  ;;  %p809_p12 = scmp.lt.s32.totalorder %s472_s28, %s472_s28 }
  0x40   :  { %556 = vmatprep.subr.mxu0 %v839_v0  ;;  %591 = vmatprep.subr.mxu1 %v839_v0  ;;  %v196_v12 = vld [vmem:[#allocation7 + $0x58] sm:$0xff]  ;;  %v99_v13 = vld [vmem:[#allocation5 + $0x40] sm:$0xff]  ;;  %v195_v14 = vld [vmem:[#allocation7 + $0x50] sm:$0xff]  ;;  %p805_p11 = scmp.ne.s32.totalorder %s472_s28, %s804_s29  ;;  %p810_p13 = scmp.lt.s32.totalorder %s804_s29, %s804_s29 }
  0x41   :  { %557 = vmatpush3.msra.mxu0 %v105_v2  ;;  %592 = vmatpush3.msra.mxu1 %v199_v7  ;;  %v98_v15 = vld [vmem:[#allocation5 + $0x38] sm:$0xff]  ;;  %v194_v16 = vld [vmem:[#allocation7 + $0x48] sm:$0xff]  ;;  %v97_v17 = vld [vmem:[#allocation5 + $0x30] sm:$0xff] }
  0x42   :  { %558 = vmatprep.subr.mxu0 %v839_v0  ;;  %593 = vmatprep.subr.mxu1 %v839_v0  ;;  %v193_v18 = vld [vmem:[#allocation7 + $0x40] sm:$0xff]  ;;  %v96_v19 = vld [vmem:[#allocation5 + $0x28] sm:$0xff]  ;;  %v192_v20 = vld [vmem:[#allocation7 + $0x38] sm:$0xff]  ;;  %p811_p0 = por %p810_p13, %p809_p12 }
  0x43   :  { %559 = vmatpush3.msra.mxu0 %v104_v3  ;;  %594 = vmatpush3.msra.mxu1 %v198_v8  ;;  %v95_v21 = vld [vmem:[#allocation5 + $0x20] sm:$0xff]  ;;  %v191_v22 = vld [vmem:[#allocation7 + $0x30] sm:$0xff]  ;;  %v94_v23 = vld [vmem:[#allocation5 + $0x18] sm:$0xff] }
  0x44   :  { %560 = vmatprep.subr.mxu0 %v839_v0  ;;  %595 = vmatprep.subr.mxu1 %v839_v0  ;;  %v190_v24 = vld [vmem:[#allocation7 + $0x28] sm:$0xff]  ;;  %v93_v25 = vld [vmem:[#allocation5 + $0x10] sm:$0xff]  ;;  %v189_v26 = vld [vmem:[#allocation7 + $0x20] sm:$0xff]  ;;  %p812_p1 = pnand %p811_p0, %p805_p11 }
  0x45   :  { %561 = vmatpush3.msra.mxu0 %v103_v4  ;;  %596 = vmatpush3.msra.mxu1 %v197_v10  ;;  %v92_v27 = vld [vmem:[#allocation5 + $0x8] sm:$0xff]  ;;  %v188_v28 = vld [vmem:[#allocation7 + $0x18] sm:$0xff]  ;;  %v91_v29 = vld [vmem:[#allocation5] sm:$0xff] }
  0x46   :  { %562 = vmatprep.subr.mxu0 %v839_v0  ;;  %597 = vmatprep.subr.mxu1 %v839_v0  ;;  %v90_v30 = vld [vmem:[#allocation2] sm:$0xff]  ;;  %v187_v31 = vld [vmem:[#allocation7 + $0x10] sm:$0xff]  ;;  %v186_v32 = vld [vmem:[#allocation7 + $0x8] sm:$0xff] }
  0x47   :  { %563 = vmatpush3.msra.mxu0 %v102_v6  ;;  %598 = vmatpush3.msra.mxu1 %v196_v12  ;;  %v185_v33 = vld [vmem:[#allocation7] sm:$0xff]  ;;  %v294_v34 = vld [vmem:[#allocation8 + $0x78] sm:$0xff]  ;;  %v293_v35 = vld [vmem:[#allocation8 + $0x70] sm:$0xff] }
  0x48   :  { %564 = vmatprep.subr.mxu0 %v839_v0  ;;  %599 = vmatprep.subr.mxu1 %v839_v0  ;;  %v292_v36 = vld [vmem:[#allocation8 + $0x68] sm:$0xff]  ;;  %v291_v37 = vld [vmem:[#allocation8 + $0x60] sm:$0xff]  ;;  %v290_v38 = vld [vmem:[#allocation8 + $0x58] sm:$0xff] }
  0x49   :  { %565 = vmatpush3.msra.mxu0 %v101_v9  ;;  %600 = vmatpush3.msra.mxu1 %v195_v14  ;;  %v289_v39 = vld [vmem:[#allocation8 + $0x50] sm:$0xff]  ;;  %v288_v40 = vld [vmem:[#allocation8 + $0x48] sm:$0xff]  ;;  %v287_v41 = vld [vmem:[#allocation8 + $0x40] sm:$0xff] }
  0x4a   :  { %566 = vmatprep.subr.mxu0 %v839_v0  ;;  %601 = vmatprep.subr.mxu1 %v839_v0  ;;  %v286_v42 = vld [vmem:[#allocation8 + $0x38] sm:$0xff]  ;;  %v285_v43 = vld [vmem:[#allocation8 + $0x30] sm:$0xff]  ;;  %v284_v44 = vld [vmem:[#allocation8 + $0x28] sm:$0xff] }
  0x4b   :  { %567 = vmatpush3.msra.mxu0 %v100_v11  ;;  %602 = vmatpush3.msra.mxu1 %v194_v16  ;;  %v283_v45 = vld [vmem:[#allocation8 + $0x20] sm:$0xff]  ;;  %v282_v46 = vld [vmem:[#allocation8 + $0x18] sm:$0xff]  ;;  %v281_v53 = vld [vmem:[#allocation8 + $0x10] sm:$0xff] }
  0x4c   :  { %568 = vmatprep.subr.mxu0 %v839_v0  ;;  %603 = vmatprep.subr.mxu1 %v839_v0  ;;  %v482_v47 = vld [vmem:[%s996_s5] ss:$0 sm:$0xff]  ;;  %v280_v54 = vld [vmem:[#allocation8 + $0x8] sm:$0xff]  ;;  %v279_v55 = vld [vmem:[#allocation8] sm:$0xff] }
  0x4d   :  { %569 = vmatpush3.msra.mxu0 %v99_v13  ;;  %604 = vmatpush3.msra.mxu1 %v193_v18  ;;  %v388_v56 = vld [vmem:[#allocation10 + $0x78] sm:$0xff]  ;;  %v387_v57 = vld [vmem:[#allocation10 + $0x70] sm:$0xff]  ;;  %v386_v58 = vld [vmem:[#allocation10 + $0x68] sm:$0xff] }
  0x4e   :  { %570 = vmatprep.subr.mxu0 %v839_v0  ;;  %605 = vmatprep.subr.mxu1 %v839_v0  ;;  %v385_v59 = vld [vmem:[#allocation10 + $0x60] sm:$0xff]  ;;  %v384_v60 = vld [vmem:[#allocation10 + $0x58] sm:$0xff]  ;;  %v383_v61 = vld [vmem:[#allocation10 + $0x50] sm:$0xff] }
  0x4f   :  { %571 = vmatpush3.msra.mxu0 %v98_v15  ;;  %606 = vmatpush3.msra.mxu1 %v192_v20  ;;  %v382_v62 = vld [vmem:[#allocation10 + $0x48] sm:$0xff]  ;;  %v381_v63 = vld [vmem:[#allocation10 + $0x40] sm:$0xff]  ;;  %v380_v1 = vld [vmem:[#allocation10 + $0x38] sm:$0xff] }
  0x50   :  { %572 = vmatprep.subr.mxu0 %v839_v0  ;;  %607 = vmatprep.subr.mxu1 %v839_v0  ;;  %v379_v2 = vld [vmem:[#allocation10 + $0x30] sm:$0xff]  ;;  %v378_v3 = vld [vmem:[#allocation10 + $0x28] sm:$0xff]  ;;  %v377_v4 = vld [vmem:[#allocation10 + $0x20] sm:$0xff] }
  0x51   :  { %573 = vmatpush3.msra.mxu0 %v97_v17  ;;  %608 = vmatpush3.msra.mxu1 %v191_v22  ;;  %v376_v5 = vld [vmem:[#allocation10 + $0x18] sm:$0xff]  ;;  %v375_v12 = vld [vmem:[#allocation10 + $0x10] sm:$0xff]  ;;  %v374_v13 = vld [vmem:[#allocation10 + $0x8] sm:$0xff] }
  0x52   :  { %574 = vmatprep.subr.mxu0 %v839_v0  ;;  %609 = vmatprep.subr.mxu1 %v839_v0  ;;  %v483_v6 = vld [vmem:[%s996_s5 + $0x1] ss:$0 sm:$0xff]  ;;  %v373_v14 = vld [vmem:[#allocation10] sm:$0xff]  ;;  %v484_v15 = vld [vmem:[%s996_s5 + $0x2] ss:$0 sm:$0xff] }
  0x53   :  { %575 = vmatpush3.msra.mxu0 %v96_v19  ;;  %610 = vmatpush3.msra.mxu1 %v190_v24 }
  0x54   :  { %576 = vmatprep.subr.mxu0 %v839_v0  ;;  %611 = vmatprep.subr.mxu1 %v839_v0 }
  0x55   :  { %577 = vmatpush3.msra.mxu0 %v95_v21  ;;  %612 = vmatpush3.msra.mxu1 %v189_v26  ;;  %v485_v21 = vld [vmem:[%s996_s5 + $0x3] ss:$0 sm:$0xff] }
  0x56   :  { %578 = vmatprep.subr.mxu0 %v839_v0  ;;  %613 = vmatprep.subr.mxu1 %v839_v0 }
  0x57   :  { %579 = vmatpush3.msra.mxu0 %v94_v23  ;;  %614 = vmatpush3.msra.mxu1 %v188_v28 }
  0x58   :  { %580 = vmatprep.subr.mxu0 %v839_v0  ;;  %615 = vmatprep.subr.mxu1 %v839_v0 }
  0x59   :  { %581 = vmatpush3.msra.mxu0 %v93_v25  ;;  %616 = vmatpush3.msra.mxu1 %v187_v31 }
  0x5a   :  { %582 = vmatprep.subr.mxu0 %v839_v0  ;;  %617 = vmatprep.subr.mxu1 %v839_v0 }
  0x5b   :  { %583 = vmatpush3.msra.mxu0 %v92_v27  ;;  %618 = vmatpush3.msra.mxu1 %v186_v32 }
  0x5c   :  { %584 = vmatprep.subr.mxu0 %v839_v0  ;;  %619 = vmatprep.subr.mxu1 %v839_v0 }
  0x5d   :  { %585 = vmatpush3.msra.mxu0 %v91_v29  ;;  %620 = vmatpush3.msra.mxu1 %v185_v33 }
  0x5e   :  { %587 = vmatmul.mubr.f32.vlgmr.msra.gmra.mxu0 %v90_v30  ;;  %624 = vmatprep.subr.mxu0 %v839_v0 }
  0x5f   :  { %656 = vmatprep.mubr.msk.f32.mxu0 %vm840_vm0, %v839_v0  ;;  %659 = vmatprep.subr.mxu1 %v839_v0 }
  0x60   :  { %625 = vmatpush3.msra.mxu0 %v294_v34 }
  0x61   :  { %626 = vmatprep.subr.mxu0 %v839_v0 }
  0x62   :  { %627 = vmatpush3.msra.mxu0 %v293_v35 }
  0x63   :  { %628 = vmatprep.subr.mxu0 %v839_v0 }
  0x64   :  { %629 = vmatpush3.msra.mxu0 %v292_v36 }
  0x65   :  { %630 = vmatprep.subr.mxu0 %v839_v0 }
  0x66   :  { %631 = vmatpush3.msra.mxu0 %v291_v37 }
  0x67   :  { %632 = vmatprep.subr.mxu0 %v839_v0 }
  0x68   :  { %633 = vmatpush3.msra.mxu0 %v290_v38 }
  0x69   :  { %634 = vmatprep.subr.mxu0 %v839_v0 }
  0x6a   :  { %635 = vmatpush3.msra.mxu0 %v289_v39 }
  0x6b   :  { %636 = vmatprep.subr.mxu0 %v839_v0 }
  0x6c   :  { %637 = vmatpush3.msra.mxu0 %v288_v40 }
  0x6d   :  { %638 = vmatprep.subr.mxu0 %v839_v0 }
  0x6e   :  { %639 = vmatpush3.msra.mxu0 %v287_v41 }
  0x6f   :  { %640 = vmatprep.subr.mxu0 %v839_v0 }
  0x70   :  { %641 = vmatpush3.msra.mxu0 %v286_v42 }
  0x71   :  { %642 = vmatprep.subr.mxu0 %v839_v0 }
  0x72   :  { %643 = vmatpush3.msra.mxu0 %v285_v43 }
  0x73   :  { %644 = vmatprep.subr.mxu0 %v839_v0 }
  0x74   :  { %645 = vmatpush3.msra.mxu0 %v284_v44 }
  0x75   :  { %646 = vmatprep.subr.mxu0 %v839_v0 }
  0x76   :  { %647 = vmatpush3.msra.mxu0 %v283_v45 }
  0x77   :  { %648 = vmatprep.subr.mxu0 %v839_v0 }
  0x78   :  { %649 = vmatpush3.msra.mxu0 %v282_v46 }
  0x79   :  { %650 = vmatprep.subr.mxu0 %v839_v0 }
  0x7a   :  { %651 = vmatpush3.msra.mxu0 %v281_v53 }
  0x7b   :  { %652 = vmatprep.subr.mxu0 %v839_v0 }
  0x7c   :  { %653 = vmatpush3.msra.mxu0 %v280_v54 }
  0x7d   :  { %654 = vmatprep.subr.mxu0 %v839_v0 }
  0x7e   :  { %655 = vmatpush3.msra.mxu0 %v279_v55 }
 0x11e   :  { %v178_v48 = vpop.f32.mrf.mxu0 }
 0x11f   :  { %v179_v49 = vadd.f32 %v482_v47, %v178_v48 }
 0x120   :  { %v588_v50 = vpop.f32.mrf.mxu0 }
 0x121   :  { %v183_v51 = vmul.f32 0.22916667, %v179_v49  ;;  %vm182_vm1 = vcmp.ge.f32.partialorder %v179_v49, 0.0 }
 0x123   :  { %v184_v52 = vsel %vm182_vm1, %v179_v49, %v183_v51 }
 0x124   :  { %622 = vmatmul.mubr.f32.vlgmr.msra.gmra.mxu1 %v184_v52 }
 0x125   :  { %691 = vmatprep.mubr.msk.f32.mxu1 %vm840_vm0, %v839_v0  ;;  %660 = vmatpush3.msra.mxu1 %v388_v56 }
 0x126   :  { %661 = vmatprep.subr.mxu1 %v839_v0 }
 0x127   :  { %662 = vmatpush3.msra.mxu1 %v387_v57 }
 0x128   :  { %663 = vmatprep.subr.mxu1 %v839_v0 }
 0x129   :  { %664 = vmatpush3.msra.mxu1 %v386_v58 }
 0x12a   :  { %665 = vmatprep.subr.mxu1 %v839_v0 }
 0x12b   :  { %666 = vmatpush3.msra.mxu1 %v385_v59 }
 0x12c   :  { %667 = vmatprep.subr.mxu1 %v839_v0 }
 0x12d   :  { %668 = vmatpush3.msra.mxu1 %v384_v60 }
 0x12e   :  { %669 = vmatprep.subr.mxu1 %v839_v0 }
 0x12f   :  { %670 = vmatpush3.msra.mxu1 %v383_v61 }
 0x130   :  { %671 = vmatprep.subr.mxu1 %v839_v0 }
 0x131   :  { %672 = vmatpush3.msra.mxu1 %v382_v62 }
 0x132   :  { %673 = vmatprep.subr.mxu1 %v839_v0 }
 0x133   :  { %674 = vmatpush3.msra.mxu1 %v381_v63 }
 0x134   :  { %675 = vmatprep.subr.mxu1 %v839_v0 }
 0x135   :  { %676 = vmatpush3.msra.mxu1 %v380_v1 }
 0x136   :  { %677 = vmatprep.subr.mxu1 %v839_v0 }
 0x137   :  { %678 = vmatpush3.msra.mxu1 %v379_v2 }
 0x138   :  { %679 = vmatprep.subr.mxu1 %v839_v0 }
 0x139   :  { %680 = vmatpush3.msra.mxu1 %v378_v3 }
 0x13a   :  { %681 = vmatprep.subr.mxu1 %v839_v0 }
 0x13b   :  { %682 = vmatpush3.msra.mxu1 %v377_v4 }
 0x13c   :  { %683 = vmatprep.subr.mxu1 %v839_v0 }
 0x13d   :  { %684 = vmatpush3.msra.mxu1 %v376_v5 }
 0x13e   :  { %685 = vmatprep.subr.mxu1 %v839_v0 }
 0x13f   :  { %686 = vmatpush3.msra.mxu1 %v375_v12 }
 0x140   :  { %687 = vmatprep.subr.mxu1 %v839_v0 }
 0x141   :  { %688 = vmatpush3.msra.mxu1 %v374_v13 }
 0x142   :  { %689 = vmatprep.subr.mxu1 %v839_v0 }
 0x143   :  { %690 = vmatpush3.msra.mxu1 %v373_v14 }
 0x1e4   :  { %v272_v7 = vpop.f32.mrf.mxu1 }
 0x1e5   :  { %v273_v8 = vadd.f32 %v483_v6, %v272_v7 }
 0x1e6   :  { %v623_v9 = vpop.f32.mrf.mxu1 }
 0x1e7   :  { %vm276_vm2 = vcmp.ge.f32.partialorder %v273_v8, 0.0  ;;  %v277_v10 = vmul.f32 0.22916667, %v273_v8 }
 0x1e9   :  { %v278_v11 = vsel %vm276_vm2, %v273_v8, %v277_v10 }
 0x1ea   :  { %657 = vmatmul.mubr.f32.vlgmr.msra.gmra.mxu0 %v278_v11 }
 0x2aa   :  { %v366_v16 = vpop.f32.mrf.mxu0 }
 0x2ab   :  { %v367_v17 = vadd.f32 %v484_v15, %v366_v16 }
 0x2ac   :  { %v658_v18 = vpop.f32.mrf.mxu0 }
 0x2ad   :  { %vm370_vm3 = vcmp.ge.f32.partialorder %v367_v17, 0.0  ;;  %v371_v19 = vmul.f32 0.22916667, %v367_v17 }
 0x2af   :  { %v372_v20 = vsel %vm370_vm3, %v367_v17, %v371_v19 }
 0x2b0   :  { %692 = vmatmul.mubr.f32.vlgmr.msra.gmra.mxu1 %v372_v20 }
 0x370   :  { %v460_v22 = vpop.f32.mrf.mxu1 }
 0x371   :  { %v461_v0 = vadd.f32 %v485_v21, %v460_v22 }
 0x372   :  { %v693_v23 = vpop.f32.mrf.mxu1 }
 0x373   :  { %464 = vst [vmem:[#allocation11] sm:$0xff] %v461_v0 }
 0x374   :  { %815 = shalt.err (!%p812_p1)
}
 0x375   :  { %474 = dma.vmem_to_hbm [thread:$0]  %s472_s28, 128, %s997_s6, [#allocation4]  }
 0x376   :  { %830 = dma.done.wait [#allocation4], 128  }
 0x377   :  { %831 = vsyncadd [#allocation4], 4294967168 }
 0x378   :  { %478 = vsyncpa [#allocation3], 1 }
 0x379   :  { %479 = vsyncpa [#allocation6], 1 }
 0x37a   :  { %480 = vsyncpa [#allocation9], 1 }
 0x37b   :  { %481 = vsyncpa [#allocation4], 1 }

</bundles_post_ra>
